<compile_context>
chip_gen: v6e
topology: v6e:2x2x1
jax: 0.10.0
libtpu: 0.0.40
codegen_flags: <defaults>
</compile_context>

<pallas_src>
import math

import jax
import jax.numpy as jnp
from jax.experimental import pallas as pl
from jax.experimental.pallas import tpu as pltpu

# ---- synthetic "config" (the torch module reads these from a config dict) ----
CONFIG = dict(
    cluster_num=4,
    token_dist_sample=11,
    actor_l2_in=32,
    actor_l3_in=32,
    threshold_num=8,
    critic_l2_in=32,
    critic_l3_in=16,
)
FEAT = 1 + CONFIG["cluster_num"] + CONFIG["token_dist_sample"]   # 16
IN_DIM = 2 * FEAT                                                 # 32 (state ++ state^2)

A2 = CONFIG["actor_l2_in"]      # 32
A3 = CONFIG["actor_l3_in"]      # 32
C2 = CONFIG["critic_l2_in"]     # 32
C3 = CONFIG["critic_l3_in"]     # 16
NPI = CONFIG["threshold_num"]   # 8

PAD = 128                       # lane width for all fused activations/weights

# --- packed-parameter slab row layout (all block starts 8-row aligned) ---
W1_R0 = 0                       # rows [0, 32)    : fused layer-1 weights  (32, 128)
W2_R0 = W1_R0 + IN_DIM          # rows [32, 160)  : fused layer-2 weights  (128, 128)
W3_R0 = W2_R0 + PAD             # rows [160, 288) : fused head weights     (128, 128)
B_R0 = W3_R0 + PAD              # rows [288, 296) : biases (row 288=b1, 289=b2, 290=b3)
SLAB_ROWS = B_R0 + 8            # 296


def _ac_kernel(s_ref, slab_ref, out_ref):
    """Fused actor+critic forward for one state vector.

    s_ref:   (1, FEAT) f32
    slab_ref:(SLAB_ROWS, 128) f32 packed parameters
    out_ref: (1, 128) f32 -- lanes 0..7 = pi (softmax'd), lane 8 = v, rest 0.
    """
    s = s_ref[...]                                       # (1, FEAT)
    x = jnp.concatenate([s, s * s], axis=-1)             # (1, 2*FEAT) = torch.cat((state, state**2))

    w1 = slab_ref[W1_R0:W1_R0 + IN_DIM, :]               # (32, 128)
    w2 = slab_ref[W2_R0:W2_R0 + PAD, :]                  # (128, 128)
    w3 = slab_ref[W3_R0:W3_R0 + PAD, :]                  # (128, 128)
    b = slab_ref[B_R0:B_R0 + 8, :]                       # (8, 128)
    b1 = b[0:1, :]
    b2 = b[1:2, :]
    b3 = b[2:3, :]

    # Fused layer 1: actor hidden -> lanes [0,32), critic hidden -> lanes [32,64).
    h1 = jnp.tanh(jnp.dot(x, w1, preferred_element_type=jnp.float32) + b1)     # (1, 128)
    # Fused layer 2 (block-diagonal): actor -> lanes [0,32), critic -> lanes [32,48).
    h2 = jnp.tanh(jnp.dot(h1, w2, preferred_element_type=jnp.float32) + b2)    # (1, 128)
    # Fused heads (block-diagonal): pi logits -> lanes [0,8), v -> lane 8.
    o = jnp.dot(h2, w3, preferred_element_type=jnp.float32) + b3               # (1, 128)

    # Masked softmax over the pi lanes only (v at lane NPI is untouched).
    lane = jax.lax.broadcasted_iota(jnp.int32, o.shape, 1)
    is_pi = lane < NPI
    logits = jnp.where(is_pi, o, -jnp.inf)
    m = jnp.max(logits, axis=-1, keepdims=True)
    e = jnp.where(is_pi, jnp.exp(o - m), 0.0)
    pi = e * pl.reciprocal(jnp.sum(e, axis=-1, keepdims=True), approx=False)

    out_ref[...] = jnp.where(is_pi, pi, jnp.where(lane == NPI, o, 0.0))


def init_params(key):
    """Deterministic PyTorch-default-style init (uniform +/- 1/sqrt(fan_in)).

    Weights stored transposed, i.e. (in_features, out_features); biases as
    (1, out_features) rows.  Used both for the reference and for packing.
    """
    layer_dims = [
        ("actor_fc2", IN_DIM, A2),
        ("actor_fc3", A2, A3),
        ("fc_pi", A3, NPI),
        ("critic_fc2", IN_DIM, C2),
        ("critic_fc3", C2, C3),
        ("fc_v", C3, 1),
    ]
    params = {}
    for name, fan_in, fan_out in layer_dims:
        key, kw, kb = jax.random.split(key, 3)
        bound = 1.0 / math.sqrt(fan_in)
        params[name + "_w"] = jax.random.uniform(
            kw, (fan_in, fan_out), jnp.float32, -bound, bound)
        params[name + "_b"] = jax.random.uniform(
            kb, (1, fan_out), jnp.float32, -bound, bound)
    return params


def pack_params(params):
    """Pack all weights/biases into one (SLAB_ROWS, 128) f32 slab (host-side, once)."""
    slab = jnp.zeros((SLAB_ROWS, PAD), jnp.float32)
    # Fused layer 1: [Wa2 | Wc2] on output lanes [0,32) / [32,64).
    slab = slab.at[W1_R0:W1_R0 + IN_DIM, 0:A2].set(params["actor_fc2_w"])
    slab = slab.at[W1_R0:W1_R0 + IN_DIM, A2:A2 + C2].set(params["critic_fc2_w"])
    # Fused layer 2 (block-diagonal on the padded h1 lanes).
    slab = slab.at[W2_R0 + 0:W2_R0 + A2, 0:A3].set(params["actor_fc3_w"])
    slab = slab.at[W2_R0 + A2:W2_R0 + A2 + C2, A3:A3 + C3].set(params["critic_fc3_w"])
    # Fused heads (block-diagonal): pi on lanes [0,8), v on lane 8.
    slab = slab.at[W3_R0 + 0:W3_R0 + A3, 0:NPI].set(params["fc_pi_w"])
    slab = slab.at[W3_R0 + A3:W3_R0 + A3 + C3, NPI:NPI + 1].set(params["fc_v_w"])
    # Biases (one row each; padding lanes stay 0 so padded activations stay 0).
    slab = slab.at[B_R0 + 0, 0:A2].set(params["actor_fc2_b"][0])
    slab = slab.at[B_R0 + 0, A2:A2 + C2].set(params["critic_fc2_b"][0])
    slab = slab.at[B_R0 + 1, 0:A3].set(params["actor_fc3_b"][0])
    slab = slab.at[B_R0 + 1, A3:A3 + C3].set(params["critic_fc3_b"][0])
    slab = slab.at[B_R0 + 2, 0:NPI].set(params["fc_pi_b"][0])
    slab = slab.at[B_R0 + 2, NPI:NPI + 1].set(params["fc_v_b"][0])
    return slab


@jax.jit
def two_layer_ac_forward(state, slab):
    """state: (FEAT,) f32, slab: (SLAB_ROWS, 128) f32 -> (pi: (NPI,), v: (1,))"""
    s = state.reshape(1, FEAT).astype(jnp.float32)
    vmem = pl.BlockSpec(memory_space=pltpu.MemorySpace.VMEM)
    out = pl.pallas_call(
        _ac_kernel,
        out_shape=jax.ShapeDtypeStruct((1, PAD), jnp.float32),
        in_specs=[vmem, vmem],
        out_specs=vmem,
    )(s, slab)
    # TODO(synk): for rollout-style callers, batch states onto the MXU M dim and
    # shard batch tiles across TCs via a "parallel" grid axis (v7x megacore).
    return out[0, :NPI], out[0, NPI:NPI + 1]


def _reference_forward(state, params):
    """Pure-JAX replica of the torch forward for a correctness check."""
    s = jnp.concatenate([state, jnp.square(state)])          # (2*FEAT,)
    x = jnp.tanh(s @ params["actor_fc2_w"] + params["actor_fc2_b"][0])
    x = jnp.tanh(x @ params["actor_fc3_w"] + params["actor_fc3_b"][0])
    pi = jax.nn.softmax(x @ params["fc_pi_w"] + params["fc_pi_b"][0], axis=0)
    y = jnp.tanh(s @ params["critic_fc2_w"] + params["critic_fc2_b"][0])
    y = jnp.tanh(y @ params["critic_fc3_w"] + params["critic_fc3_b"][0])
    v = y @ params["fc_v_w"] + params["fc_v_b"][0]
    return pi, v


if __name__ == "__main__":
    key = jax.random.PRNGKey(0)
    key_params, key_state = jax.random.split(key)
    params = init_params(key_params)
    slab = pack_params(params)                       # packed once, reusable across calls
    state = jax.random.normal(key_state, (FEAT,), jnp.float32)

    pi, v = two_layer_ac_forward(state, slab)
    jax.block_until_ready((pi, v))

    ref_pi, ref_v = _reference_forward(state, params)
    assert pi.shape == (NPI,)
    assert v.shape == (1,)
    assert jnp.allclose(pi, ref_pi, atol=1e-5, rtol=1e-5)
    assert jnp.allclose(v, ref_v, atol=1e-5, rtol=1e-5)
    print("KERNEL_OK")
</pallas_src>

<mosaic_0001>
module attributes {stable_mosaic.version = 11 : i64} {
  func.func @_ac_kernel(%arg0: memref<1x16xf32, #tpu.memory_space<vmem>>, %arg1: memref<296x128xf32, #tpu.memory_space<vmem>>, %arg2: memref<1x128xf32, #tpu.memory_space<vmem>>) attributes {dimension_semantics = [], scalar_prefetch = 0 : i64, scratch_operands = 0 : i64, tpu.core_type = #tpu.core_type<tc>} {
    %c0 = arith.constant 0 : index
    %c0_0 = arith.constant 0 : index
    %0 = vector.load %arg0[%c0, %c0_0] : memref<1x16xf32, #tpu.memory_space<vmem>>, vector<1x16xf32>
    %1 = arith.mulf %0, %0 : vector<1x16xf32>
    %2 = tpu.concatenate %0, %1 in 1 : vector<1x16xf32>, vector<1x16xf32> -> vector<1x32xf32>
    %c0_1 = arith.constant 0 : index
    %c0_2 = arith.constant 0 : index
    %3 = vector.load %arg1[%c0_1, %c0_2] : memref<296x128xf32, #tpu.memory_space<vmem>>, vector<32x128xf32>
    %c32 = arith.constant 32 : index
    %c0_3 = arith.constant 0 : index
    %4 = vector.load %arg1[%c32, %c0_3] : memref<296x128xf32, #tpu.memory_space<vmem>>, vector<128x128xf32>
    %c160 = arith.constant 160 : index
    %c0_4 = arith.constant 0 : index
    %5 = vector.load %arg1[%c160, %c0_4] : memref<296x128xf32, #tpu.memory_space<vmem>>, vector<128x128xf32>
    %c288 = arith.constant 288 : index
    %c0_5 = arith.constant 0 : index
    %6 = vector.load %arg1[%c288, %c0_5] : memref<296x128xf32, #tpu.memory_space<vmem>>, vector<8x128xf32>
    %7 = vector.extract_strided_slice %6 {offsets = [0, 0], sizes = [1, 128], strides = [1, 1]} : vector<8x128xf32> to vector<1x128xf32>
    %8 = vector.extract_strided_slice %6 {offsets = [1, 0], sizes = [1, 128], strides = [1, 1]} : vector<8x128xf32> to vector<1x128xf32>
    %9 = vector.extract_strided_slice %6 {offsets = [2, 0], sizes = [1, 128], strides = [1, 1]} : vector<8x128xf32> to vector<1x128xf32>
    %cst = arith.constant dense<0.000000e+00> : vector<1x128xf32>
    %10 = tpu.matmul %2, %3, %cst {dimension_numbers = #tpu.dot_dimension_numbers<[1], [0], [0], [1], [0, 0, 1, 1], [], []>} : vector<1x32xf32>, vector<32x128xf32>, vector<1x128xf32> -> vector<1x128xf32>
    %11 = arith.addf %10, %7 : vector<1x128xf32>
    %12 = math.tanh %11 : vector<1x128xf32>
    %cst_6 = arith.constant dense<0.000000e+00> : vector<1x128xf32>
    %13 = tpu.matmul %12, %4, %cst_6 {dimension_numbers = #tpu.dot_dimension_numbers<[1], [0], [0], [1], [0, 0, 1, 1], [], []>} : vector<1x128xf32>, vector<128x128xf32>, vector<1x128xf32> -> vector<1x128xf32>
    %14 = arith.addf %13, %8 : vector<1x128xf32>
    %15 = math.tanh %14 : vector<1x128xf32>
    %cst_7 = arith.constant dense<0.000000e+00> : vector<1x128xf32>
    %16 = tpu.matmul %15, %5, %cst_7 {dimension_numbers = #tpu.dot_dimension_numbers<[1], [0], [0], [1], [0, 0, 1, 1], [], []>} : vector<1x128xf32>, vector<128x128xf32>, vector<1x128xf32> -> vector<1x128xf32>
    %17 = arith.addf %16, %9 : vector<1x128xf32>
    %18 = tpu.iota {dimensions = array<i32: 1>} : vector<1x128xi32>
    %c8_i32 = arith.constant 8 : i32
    %19 = vector.broadcast %c8_i32 : i32 to vector<1x128xi32>
    %20 = arith.cmpi slt, %18, %19 : vector<1x128xi32>
    %cst_8 = arith.constant 0xFF800000 : f32
    %21 = vector.broadcast %cst_8 : f32 to vector<1x128xf32>
    %22 = arith.select %20, %17, %21 : vector<1x128xi1>, vector<1x128xf32>
    %cst_9 = arith.constant dense<0xFF800000> : vector<1xf32>
    %23 = vector.multi_reduction <maximumf>, %22, %cst_9 [1] : vector<1x128xf32> to vector<1xf32>
    %24 = vector.shape_cast %23 : vector<1xf32> to vector<1x1xf32>
    %25 = vector.broadcast %24 : vector<1x1xf32> to vector<1x128xf32>
    %26 = arith.subf %17, %25 : vector<1x128xf32>
    %27 = math.exp %26 : vector<1x128xf32>
    %cst_10 = arith.constant 0.000000e+00 : f32
    %28 = vector.broadcast %cst_10 : f32 to vector<1x128xf32>
    %29 = arith.select %20, %27, %28 : vector<1x128xi1>, vector<1x128xf32>
    %cst_11 = arith.constant dense<0.000000e+00> : vector<1xf32>
    %30 = vector.multi_reduction <add>, %29, %cst_11 [1] : vector<1x128xf32> to vector<1xf32>
    %31 = vector.shape_cast %30 : vector<1xf32> to vector<1x1xf32>
    %32 = tpu.reciprocal %31 : vector<1x1xf32> -> vector<1x1xf32>
    %33 = vector.broadcast %32 : vector<1x1xf32> to vector<1x128xf32>
    %34 = arith.mulf %29, %33 : vector<1x128xf32>
    %c8_i32_12 = arith.constant 8 : i32
    %35 = vector.broadcast %c8_i32_12 : i32 to vector<1x128xi32>
    %36 = arith.cmpi eq, %18, %35 : vector<1x128xi32>
    %cst_13 = arith.constant 0.000000e+00 : f32
    %37 = vector.broadcast %cst_13 : f32 to vector<1x128xf32>
    %38 = arith.select %36, %17, %37 : vector<1x128xi1>, vector<1x128xf32>
    %39 = arith.select %20, %34, %38 : vector<1x128xi1>, vector<1x128xf32>
    %c0_14 = arith.constant 0 : index
    %c0_15 = arith.constant 0 : index
    %40 = vector.load %arg2[%c0_14, %c0_15] : memref<1x128xf32, #tpu.memory_space<vmem>>, vector<1x128xf32>
    tpu.vector_store %arg2[%c0_14, %c0_15], %39 {strides = array<i32>} : memref<1x128xf32, #tpu.memory_space<vmem>>, vector<1x128xf32>,
    return
  }
}

</mosaic_0001>

<bundles_post_ra>
// kernel: two_layer_ac_forward.1
= control target key start
LH: loop header
LB: loop body
LE: loop exit
PB: predicated region body
PF: predicated region fallthrough
CT: control target
= control target key end

     0   :  { %7 = vsyncpa [#allocation3], 0  ;;  %s478_s9 = smov [#allocation2]   ;;  %s555_s0 = inlined_call_operand.vmem [shape: f32[1,16], index: 0, kind: input, shape index: {}]   ;;  %s556_s1 = inlined_call_operand.hbm [shape: f32[296,128], index: 1, kind: input, shape index: {}]   ;;  %s557_s2 = inlined_call_operand.vmem [shape: f32[1,128], index: 2, kind: output, shape index: {}]  }
   0x1   :  { %s15_s10 = sshll.u32 %s478_s9, 4  ;;  %s16_s10 = int_to_ptr.vmem [resolvable:$true] %s15_s10 }
   0x2   :  { %s464_s11 = scalar_lea.vmem %s16_s10, 4736  ;;  %p469_p1 = scmp.lt.s32.totalorder %s16_s10, %s16_s10 }
   0x3   :  { %p465_p0 = scmp.ne.s32.totalorder %s16_s10, %s464_s11  ;;  %p470_p2 = scmp.lt.s32.totalorder %s464_s11, %s464_s11 }
   0x5   :  { %p471_p3 = por %p470_p2, %p469_p1 }
   0x7   :  { %p472_p4 = pnand %p471_p3, %p465_p0 }
   0x9   :  { %475 = shalt.err (!%p472_p4)
}
   0xa   :  { %s479_s12 = smov 128   ;;  %s480_s13 = smov 8  }
   0xb   :  { %21 = dma.hbm_to_vmem [thread:$0]  %s556_s1, 4736, %s16_s10, [#allocation3], %s479_s12, %s479_s12, %s480_s13  }
   0xc   :  { %476 = dma.done.wait [#allocation3], 4736  }
   0xd   :  { %477 = vsyncadd [#allocation3], 4294962560  ;;  %v28_v0 = vlaneseq  ;;  %v481_v1 = vmov 0.0   ;;  %vm482_vm0 = vmmov 0   ;;  %v25_v4 = vld [vmem:[%s555_s0] sm:$0x1] }
   0xe   :  { %361 = vmatprep.subr.mxu0 %v481_v1  ;;  %369 = vmatprep.mubr.msk.f32.mxu0 %vm482_vm0, %v481_v1  ;;  %v40_v5 = vld [vmem:[#allocation2 + $0x18] sm:$0xff]  ;;  %v39_v6 = vld [vmem:[#allocation2 + $0x10] sm:$0xff]  ;;  %v26_v7 = vmul.f32 %v25_v4, %v25_v4  ;;  %v38_v9 = vld [vmem:[#allocation2 + $0x8] sm:$0xff]  ;;  %s483_s0 = smov 16   ;;  %vm35_vm1 = vcmask 130048   ;;  %vm74_vm2 = vcmask 261120  }
   0xf   :  { %v29_v2 = vshrl.u32 %v28_v0, 7  ;;  %372 = vmatprep.subr.mxu1 %v481_v1  ;;  %404 = vmatprep.mubr.msk.f32.mxu1 %vm482_vm0, %v481_v1  ;;  %v56_v8 = vld [vmem:[#allocation2 + $0x98] sm:$0xff]  ;;  %v55_v10 = vld [vmem:[#allocation2 + $0x90] sm:$0xff]  ;;  %v37_v12 = vld [vmem:[#allocation2] sm:$0xff]  ;;  %v296_v55 = vand.u32 127, %v28_v0  ;;  %vm299_vm4 = vcmask 1040384  }
  0x10   :  { %362 = vmatpush3.msra.mxu0 %v40_v5  ;;  %373 = vmatpush3.msra.mxu1 %v56_v8  ;;  %v54_v13 = vld [vmem:[#allocation2 + $0x88] sm:$0xff]  ;;  %v53_v14 = vld [vmem:[#allocation2 + $0x80] sm:$0xff]  ;;  %v52_v15 = vld [vmem:[#allocation2 + $0x78] sm:$0xff] }
  0x11   :  { %v30_v3 = vsub.s32 0, %v29_v2  ;;  %363 = vmatprep.subr.mxu0 %v481_v1  ;;  %374 = vmatprep.subr.mxu1 %v481_v1  ;;  %v51_v16 = vld [vmem:[#allocation2 + $0x70] sm:$0xff]  ;;  %v50_v17 = vld [vmem:[#allocation2 + $0x68] sm:$0xff]  ;;  %v49_v20 = vld [vmem:[#allocation2 + $0x60] sm:$0xff]  ;;  %vm297_vm3 = vcmp.lt.s32.totalorder %v296_v55, 8  ;;  %vm312_vm5 = vcmp.eq.s32.totalorder %v296_v55, 8 }
  0x12   :  { %364 = vmatpush3.msra.mxu0 %v39_v6  ;;  %375 = vmatpush3.msra.mxu1 %v55_v10  ;;  %v48_v21 = vld [vmem:[#allocation2 + $0x58] sm:$0xff]  ;;  %v47_v22 = vld [vmem:[#allocation2 + $0x50] sm:$0xff]  ;;  %v46_v23 = vld [vmem:[#allocation2 + $0x48] sm:$0xff] }
  0x13   :  { %v31_v11 = vrot.slane %v26_v7, %v30_v3  ;;  %365 = vmatprep.subr.mxu0 %v481_v1  ;;  %376 = vmatprep.subr.mxu1 %v481_v1  ;;  %v45_v24 = vld [vmem:[#allocation2 + $0x40] sm:$0xff]  ;;  %v44_v25 = vld [vmem:[#allocation2 + $0x38] sm:$0xff]  ;;  %v43_v26 = vld [vmem:[#allocation2 + $0x30] sm:$0xff] }
  0x14   :  { %366 = vmatpush3.msra.mxu0 %v38_v9  ;;  %377 = vmatpush3.msra.mxu1 %v54_v13  ;;  %v42_v27 = vld [vmem:[#allocation2 + $0x28] sm:$0xff]  ;;  %v41_v28 = vld [vmem:[#allocation2 + $0x20] sm:$0xff]  ;;  %v72_v29 = vld [vmem:[#allocation2 + $0x118] sm:$0xff] }
  0x15   :  { %32 = vrot.lane.b32.xlu0 %v31_v11, %s483_s0  ;;  %367 = vmatprep.subr.mxu0 %v481_v1  ;;  %v71_v30 = vld [vmem:[#allocation2 + $0x110] sm:$0xff]  ;;  %v70_v31 = vld [vmem:[#allocation2 + $0x108] sm:$0xff]  ;;  %v69_v32 = vld [vmem:[#allocation2 + $0x100] sm:$0xff] }
  0x16   :  { %368 = vmatpush3.msra.mxu0 %v37_v12  ;;  %378 = vmatprep.subr.mxu1 %v481_v1  ;;  %v68_v33 = vld [vmem:[#allocation2 + $0xf8] sm:$0xff]  ;;  %v67_v34 = vld [vmem:[#allocation2 + $0xf0] sm:$0xff]  ;;  %v66_v35 = vld [vmem:[#allocation2 + $0xe8] sm:$0xff] }
  0x17   :  { %407 = vmatprep.subr.mxu0 %v481_v1  ;;  %379 = vmatpush3.msra.mxu1 %v53_v14  ;;  %v73_v36 = vld [vmem:[#allocation2 + $0x120] sm:$0xff]  ;;  %v64_v42 = vld [vmem:[#allocation2 + $0xd8] sm:$0xff]  ;;  %v63_v43 = vld [vmem:[#allocation2 + $0xd0] sm:$0xff] }
  0x18   :  { %380 = vmatprep.subr.mxu1 %v481_v1  ;;  %v65_v41 = vld [vmem:[#allocation2 + $0xe0] sm:$0xff]  ;;  %v62_v44 = vld [vmem:[#allocation2 + $0xc8] sm:$0xff]  ;;  %v60_v46 = vld [vmem:[#allocation2 + $0xb8] sm:$0xff]  ;;  %v150_v50 = vrot.slane %v73_v36, 1  ;;  %v223_v56 = vrot.slane %v73_v36, 2 }
  0x19   :  { %381 = vmatpush3.msra.mxu1 %v52_v15  ;;  %v61_v45 = vld [vmem:[#allocation2 + $0xc0] sm:$0xff]  ;;  %v59_v47 = vld [vmem:[#allocation2 + $0xb0] sm:$0xff]  ;;  %v58_v48 = vld [vmem:[#allocation2 + $0xa8] sm:$0xff] }
  0x1a   :  { %382 = vmatprep.subr.mxu1 %v481_v1  ;;  %v57_v49 = vld [vmem:[#allocation2 + $0xa0] sm:$0xff] }
  0x1b   :  { %383 = vmatpush3.msra.mxu1 %v51_v16 }
  0x1c   :  { %384 = vmatprep.subr.mxu1 %v481_v1 }
  0x1d   :  { %385 = vmatpush3.msra.mxu1 %v50_v17 }
  0x1e   :  { %386 = vmatprep.subr.mxu1 %v481_v1 }
  0x1f   :  { %387 = vmatpush3.msra.mxu1 %v49_v20 }
  0x20   :  { %388 = vmatprep.subr.mxu1 %v481_v1 }
  0x21   :  { %389 = vmatpush3.msra.mxu1 %v48_v21 }
  0x22   :  { %390 = vmatprep.subr.mxu1 %v481_v1 }
  0x23   :  { %391 = vmatpush3.msra.mxu1 %v47_v22 }
  0x24   :  { %392 = vmatprep.subr.mxu1 %v481_v1 }
  0x25   :  { %393 = vmatpush3.msra.mxu1 %v46_v23 }
  0x26   :  { %394 = vmatprep.subr.mxu1 %v481_v1 }
  0x27   :  { %395 = vmatpush3.msra.mxu1 %v45_v24 }
  0x28   :  { %396 = vmatprep.subr.mxu1 %v481_v1 }
  0x29   :  { %397 = vmatpush3.msra.mxu1 %v44_v25 }
  0x2a   :  { %398 = vmatprep.subr.mxu1 %v481_v1 }
  0x2b   :  { %399 = vmatpush3.msra.mxu1 %v43_v26 }
  0x2c   :  { %400 = vmatprep.subr.mxu1 %v481_v1 }
  0x2d   :  { %401 = vmatpush3.msra.mxu1 %v42_v27 }
  0x2e   :  { %402 = vmatprep.subr.mxu1 %v481_v1 }
  0x2f   :  { %403 = vmatpush3.msra.mxu1 %v41_v28 }
  0x87   :  { %v33_v18 = vpop.permute.xlu0 %32 }
  0x88   :  { %v36_v19 = vsel %vm35_vm1, %v25_v4, %v33_v18 }
  0x89   :  { %370 = vmatmul.mubr.msk.f32.vlgmr.msra.gmra.mxu0 %vm74_vm2, %v36_v19 }
  0x8a   :  { %439 = vmatprep.mubr.msk.f32.mxu0 %vm482_vm0, %v481_v1  ;;  %408 = vmatpush3.msra.mxu0 %v72_v29 }
  0x8b   :  { %409 = vmatprep.subr.mxu0 %v481_v1 }
  0x8c   :  { %410 = vmatpush3.msra.mxu0 %v71_v30 }
  0x8d   :  { %411 = vmatprep.subr.mxu0 %v481_v1 }
  0x8e   :  { %412 = vmatpush3.msra.mxu0 %v70_v31 }
  0x8f   :  { %413 = vmatprep.subr.mxu0 %v481_v1 }
  0x90   :  { %414 = vmatpush3.msra.mxu0 %v69_v32 }
  0x91   :  { %415 = vmatprep.subr.mxu0 %v481_v1 }
  0x92   :  { %416 = vmatpush3.msra.mxu0 %v68_v33 }
  0x93   :  { %417 = vmatprep.subr.mxu0 %v481_v1 }
  0x94   :  { %418 = vmatpush3.msra.mxu0 %v67_v34 }
  0x95   :  { %419 = vmatprep.subr.mxu0 %v481_v1 }
  0x96   :  { %420 = vmatpush3.msra.mxu0 %v66_v35 }
  0x97   :  { %421 = vmatprep.subr.mxu0 %v481_v1 }
  0x98   :  { %422 = vmatpush3.msra.mxu0 %v65_v41 }
  0x99   :  { %423 = vmatprep.subr.mxu0 %v481_v1 }
  0x9a   :  { %424 = vmatpush3.msra.mxu0 %v64_v42 }
  0x9b   :  { %425 = vmatprep.subr.mxu0 %v481_v1 }
  0x9c   :  { %426 = vmatpush3.msra.mxu0 %v63_v43 }
  0x9d   :  { %427 = vmatprep.subr.mxu0 %v481_v1 }
  0x9e   :  { %428 = vmatpush3.msra.mxu0 %v62_v44 }
  0x9f   :  { %429 = vmatprep.subr.mxu0 %v481_v1 }
  0xa0   :  { %430 = vmatpush3.msra.mxu0 %v61_v45 }
  0xa1   :  { %431 = vmatprep.subr.mxu0 %v481_v1 }
  0xa2   :  { %432 = vmatpush3.msra.mxu0 %v60_v46 }
  0xa3   :  { %433 = vmatprep.subr.mxu0 %v481_v1 }
  0xa4   :  { %434 = vmatpush3.msra.mxu0 %v59_v47 }
  0xa5   :  { %435 = vmatprep.subr.mxu0 %v481_v1 }
  0xa6   :  { %436 = vmatpush3.msra.mxu0 %v58_v48 }
  0xa7   :  { %437 = vmatprep.subr.mxu0 %v481_v1 }
  0xa8   :  { %438 = vmatpush3.msra.mxu0 %v57_v49 }
 0x149   :  { %v144_v37 = vpop.f32.mrf.mxu0 }
 0x14a   :  { %v145_v38 = vadd.f32 %v144_v37, %v73_v36 }
 0x14b   :  { %v371_v39 = vpop.f32.mrf.mxu0 }
 0x14c   :  { %448 = vtanh.f32 %v145_v38 }
 0x159   :  { %v449_v40 = vpop.eup %448 }
 0x15a   :  { %405 = vmatmul.mubr.f32.vlgmr.msra.gmra.mxu1 %v449_v40 }
 0x21a   :  { %v218_v51 = vpop.f32.mrf.mxu1 }
 0x21b   :  { %v219_v52 = vadd.f32 %v218_v51, %v150_v50 }
 0x21c   :  { %v406_v53 = vpop.f32.mrf.mxu1 }
 0x21d   :  { %450 = vtanh.f32 %v219_v52 }
 0x22a   :  { %v451_v54 = vpop.eup %450 }
 0x22b   :  { %440 = vmatmul.mubr.f32.vlgmr.msra.gmra.mxu0 %v451_v54 }
 0x2eb   :  { %v291_v57 = vpop.f32.mrf.mxu0 }
 0x2ec   :  { %v292_v58 = vadd.f32 %v291_v57, %v223_v56 }
 0x2ed   :  { %v441_v59 = vpop.f32.mrf.mxu0 }
 0x2ee   :  { %v298_v60 = vsel %vm297_vm3, %v292_v58, -inf  ;;  %v313_v7 = vsel %vm312_vm5, %v292_v58, 0.0 }
 0x2ef   :  { %v300_v61 = vsel %vm299_vm4, %v298_v60, -inf }
 0x2f0   :  { %301 = vmax.xlane.f32.xlu0 %v300_v61 }
 0x379   :  { %v302_v62 = vpop.xlane.xlu0 %301 }
 0x37a   :  { %v303_v63 = vsub.f32 %v292_v58, %v302_v62 }
 0x37c   :  { %v304_v1 = vmul.f32 1.442695, %v303_v63 }
 0x37e   :  { %452 = vpow2.f32 %v304_v1 }
 0x38b   :  { %v453_v2 = vpop.eup %452 }
 0x38c   :  { %v306_v3 = vsel %vm297_vm3, %v453_v2, 0.0 }
 0x38d   :  { %v307_v4 = vsel %vm299_vm4, %v306_v3, 0.0 }
 0x38e   :  { %308 = vadd.xlane.f32.xlu1 %v307_v4 }
 0x417   :  { %v309_v0 = vpop.xlane.xlu1 %308 }
 0x418   :  { %454 = vrcp.f32 %v309_v0 }
 0x425   :  { %v455_v5 = vpop.eup %454 }
 0x426   :  { %v311_v6 = vmul.f32 %v455_v5, %v306_v3 }
 0x428   :  { %v314_v8 = vsel %vm297_vm3, %v311_v6, %v313_v7 }
 0x429   :  { %315 = vst [vmem:[%s557_s2] sm:$0x1] %v314_v8 }
 0x42a   :  { %320 = vsyncpa [#allocation3], 1 }

</bundles_post_ra>
